<compile_context>
chip_gen: v7x
topology: tpu7x:2x2x1
jax: 0.10.0
libtpu: 0.0.40
codegen_flags: <defaults>
</compile_context>

<pallas_src>
import functools

import jax
import jax.numpy as jnp
from jax.experimental import pallas as pl
from jax.experimental.pallas import tpu as pltpu


# ---------------------------------------------------------------------------
# Fused Pallas kernel: im2col-conv(k=1,2,3) + ReLU + word/seq max-pool + MLP
# ---------------------------------------------------------------------------
def fused_kernel(x_ref, wcv_ref, bcv_ref, mask_ref, ma_ref,
                 wl1a_ref, wl1b_ref, bl1_ref, wl2_ref, bl2_ref, out_ref,
                 *, SWP, CCp, B_blk):
    """One grid step = B_blk batch elements (each SWP im2col word rows).

    x_ref:    (B_blk, SWP, 3C) bf16 im2col rows (taps 0/1/2 concatenated)
    wcv_ref:  (3C, 3*CCp)      bf16 block-stacked conv1/2/3 weights
    bcv_ref:  (1, 3*CCp)       f32  fused conv bias
    mask_ref: (SWP, 3*CCp)     f32  0/1 conv-window validity mask
    ma_ref:   (B_blk, 1, MA)   f32
    wl1a_ref: (3*CCp, LC)      f32  linear1 rows for pooled conv features
    wl1b_ref: (MA, LC)         f32  linear1 rows for ma features
    out_ref:  (B_blk, 1, OUT)  f32
    """
    O = 3 * CCp
    xb = x_ref[...]                                   # (B_blk, SWP, 3C) bf16
    K = xb.shape[-1]
    R = B_blk * SWP

    # Single fused conv1/conv2/conv3 matmul into one lane-dense slab.
    y = (jnp.dot(xb.reshape(R, K), wcv_ref[...],
                 preferred_element_type=jnp.float32)
         + bcv_ref[...])                              # (R, O) f32

    # ReLU, then zero out invalid conv windows / pad rows via the precomputed
    # mask. Safe ONLY because post-ReLU valid values are >= 0, so 0 never wins
    # the max-pool below.
    y = jnp.maximum(y, 0.0).reshape(B_blk, SWP, O) * mask_ref[...][None]

    # AdaptiveMaxPool1d over words fused with the seq-level max pool:
    # one max over all S*W rows of each batch element.
    pooled = jnp.max(y, axis=1)                       # (B_blk, O)

    # MLP head: concat([pooled, ma]) @ wl1 done as split dot + dot (no concat).
    ma = ma_ref[...].reshape(B_blk, -1)
    h = (jnp.dot(pooled, wl1a_ref[...], preferred_element_type=jnp.float32)
         + jnp.dot(ma, wl1b_ref[...], preferred_element_type=jnp.float32)
         + bl1_ref[...])
    h = jax.nn.sigmoid(h)
    # TODO(synk): nn.Dropout(0.5) is identity at inference; training-mode RNG not modeled.
    out = jnp.dot(h, wl2_ref[...], preferred_element_type=jnp.float32) + bl2_ref[...]
    out_ref[...] = out.reshape(B_blk, 1, -1).astype(out_ref.dtype)


# ---------------------------------------------------------------------------
# Host-side weight assembly (padding + conv fusion + linear1 split)
# ---------------------------------------------------------------------------
def assemble_params(params, c, cc, ccp, ma_feats):
    o = 3 * ccp
    lc = params["wl1"].shape[1]
    out_ch = params["wl2"].shape[1]

    # Block-stacked im2col conv weight: rows [0:C]=tap0, [C:2C]=tap1, [2C:3C]=tap2;
    # columns [k*ccp : k*ccp+cc] = branch with kernel_size k+1.
    wcv = jnp.zeros((3 * c, o), jnp.float32)
    bcv = jnp.zeros((1, o), jnp.float32)

    # branch k=1 (tap 0 only)
    wcv = wcv.at[0:c, 0:cc].set(params["w1"][0])
    bcv = bcv.at[0, 0:cc].set(params["b1"])
    # branch k=2 (taps 0,1)
    wcv = wcv.at[0:c, ccp:ccp + cc].set(params["w2"][0])
    wcv = wcv.at[c:2 * c, ccp:ccp + cc].set(params["w2"][1])
    bcv = bcv.at[0, ccp:ccp + cc].set(params["b2"])
    # branch k=3 (taps 0,1,2)
    wcv = wcv.at[0:c, 2 * ccp:2 * ccp + cc].set(params["w3"][0])
    wcv = wcv.at[c:2 * c, 2 * ccp:2 * ccp + cc].set(params["w3"][1])
    wcv = wcv.at[2 * c:3 * c, 2 * ccp:2 * ccp + cc].set(params["w3"][2])
    bcv = bcv.at[0, 2 * ccp:2 * ccp + cc].set(params["b3"])

    # linear1 split: rows for pooled conv features (padded layout) + rows for ma
    wl1 = params["wl1"]                                    # (3*cc + ma, lc)
    wl1a = jnp.zeros((o, lc), jnp.float32)
    for kb in range(3):
        wl1a = wl1a.at[kb * ccp:kb * ccp + cc, :].set(wl1[kb * cc:(kb + 1) * cc, :])
    wl1b = wl1[3 * cc:3 * cc + ma_feats, :]

    return dict(
        wcv=wcv.astype(jnp.bfloat16), bcv=bcv,
        wl1a=wl1a, wl1b=wl1b,
        bl1=params["bl1"].reshape(1, lc),
        wl2=params["wl2"], bl2=params["bl2"].reshape(1, out_ch),
    )


# ---------------------------------------------------------------------------
# Wrapper
# ---------------------------------------------------------------------------
def cnn_forward(x, ma, params, *, max_rows=2048):
    """x: (B, S, W, C) float32, ma: (B, MA) float32 -> (B, OUT) float32."""
    b, s, w, c = x.shape
    assert w >= 3, "words_nums must be >= 3 (conv3 kernel_size=3)"
    cc = params["w1"].shape[-1]
    ma_feats = ma.shape[1]
    lc = params["wl1"].shape[1]
    out_ch = params["wl2"].shape[1]

    ccp = ((cc + 127) // 128) * 128          # lane-pad conv_channel to 128
    o = 3 * ccp
    kdim = 3 * c                             # im2col contraction depth
    sw = s * w
    swp = ((sw + 7) // 8) * 8                # sublane-pad rows per batch element

    # Batch-block size: as many batch elements per grid step as fit the row
    # budget; keep >= 2 grid steps when B >= 2 so both v7x TCs get work.
    b_blk = max(1, min(b, max_rows // swp))
    grid_n = pl.cdiv(b, b_blk)
    if b >= 2 and grid_n < 2:
        b_blk = pl.cdiv(b, 2)
        grid_n = pl.cdiv(b, b_blk)
    b_pad = grid_n * b_blk

    fused = assemble_params(params, c, cc, ccp, ma_feats)

    # Host-side im2col: word row j carries taps (x[j], x[j+1], x[j+2]) within
    # its own sample (taps past the sample end are zero -> masked anyway).
    xp = jnp.pad(x, ((0, 0), (0, 0), (0, 2), (0, 0)))
    x_im = jnp.concatenate(
        [xp[:, :, 0:w, :], xp[:, :, 1:w + 1, :], xp[:, :, 2:w + 2, :]], axis=-1)
    x_im = x_im.reshape(b, sw, kdim)
    x_im = jnp.pad(x_im, ((0, b_pad - b), (0, swp - sw), (0, 0))).astype(jnp.bfloat16)

    ma3 = jnp.pad(ma.astype(jnp.float32), ((0, b_pad - b), (0, 0)))
    ma3 = ma3.reshape(b_pad, 1, ma_feats)

    # Precomputed, grid-invariant conv-window validity mask (SWP, 3*CCp):
    # row r (word index r % W within a sample) is valid for branch k iff
    # (r % W) < W - k, and only for the first S*W real rows.
    row = jnp.arange(swp)
    kb = jnp.arange(o) // ccp                                # branch 0/1/2
    mask = (((row % w)[:, None] < (w - kb[None, :])) &
            (row < sw)[:, None]).astype(jnp.float32)

    # Explicit VMEM budget (matters on v7x's 64 MiB physical / 32 MiB scoped).
    vmem_need = (
        2 * b_blk * swp * kdim * 2                 # x, double-buffered, bf16
        + 2 * b_blk * ma_feats * 4                 # ma, double-buffered
        + kdim * o * 2 + swp * o * 4 + o * 4       # wcv + mask + bias
        + o * lc * 4 + ma_feats * lc * 4 + lc * 4  # head weights
        + lc * out_ch * 4 + out_ch * 4
        + 2 * b_blk * out_ch * 4                   # out, double-buffered
        + 3 * b_blk * swp * o * 4                  # in-kernel f32 activation temps
    )
    vmem_limit = int(min(100 * 2**20, max(32 * 2**20, 2 * vmem_need)))

    kernel = functools.partial(fused_kernel, SWP=swp, CCp=ccp, B_blk=b_blk)

    const = lambda i: (0, 0)
    out = pl.pallas_call(
        kernel,
        out_shape=jax.ShapeDtypeStruct((b_pad, 1, out_ch), jnp.float32),
        grid=(grid_n,),
        in_specs=[
            pl.BlockSpec((b_blk, swp, kdim), lambda i: (i, 0, 0)),    # x (im2col)
            pl.BlockSpec((kdim, o), const),                           # fused conv W
            pl.BlockSpec((1, o), const),                              # conv bias
            pl.BlockSpec((swp, o), const),                            # validity mask
            pl.BlockSpec((b_blk, 1, ma_feats), lambda i: (i, 0, 0)),  # ma
            pl.BlockSpec((o, lc), const),                             # wl1a
            pl.BlockSpec((ma_feats, lc), const),                      # wl1b
            pl.BlockSpec((1, lc), const),                             # bl1
            pl.BlockSpec((lc, out_ch), const),                        # wl2
            pl.BlockSpec((1, out_ch), const),                         # bl2
        ],
        out_specs=pl.BlockSpec((b_blk, 1, out_ch), lambda i: (i, 0, 0)),
        compiler_params=pltpu.CompilerParams(
            dimension_semantics=("parallel",),
            vmem_limit_bytes=vmem_limit),
    )(x_im, fused["wcv"], fused["bcv"], mask, ma3,
      fused["wl1a"], fused["wl1b"], fused["bl1"], fused["wl2"], fused["bl2"])

    return out.reshape(b_pad, out_ch)[:b]


# ---------------------------------------------------------------------------
# Deterministic synthetic parameters (shapes from CNNModel.__init__)
# Conv weights stored tap-major as (k, C, CC); PyTorch's (CC, C, k) layout is
# just a transpose of this and both reference and kernel use this layout.
# ---------------------------------------------------------------------------
def init_params(key, c, cc, ma_feats, lc, out_ch):
    ks = jax.random.split(key, 10)

    def rnd(k, shape, scale=0.1):
        return (scale * jax.random.normal(k, shape)).astype(jnp.float32)

    return dict(
        w1=rnd(ks[0], (1, c, cc)), b1=rnd(ks[1], (cc,), 0.05),
        w2=rnd(ks[2], (2, c, cc)), b2=rnd(ks[3], (cc,), 0.05),
        w3=rnd(ks[4], (3, c, cc)), b3=rnd(ks[5], (cc,), 0.05),
        wl1=rnd(ks[6], (3 * cc + ma_feats, lc)), bl1=rnd(ks[7], (lc,), 0.05),
        wl2=rnd(ks[8], (lc, out_ch)), bl2=rnd(ks[9], (out_ch,), 0.05),
    )


# ---------------------------------------------------------------------------
# Pure-JAX (f32) reference for verification
# ---------------------------------------------------------------------------
def ref_forward(x, ma, params):
    b, s, w, c = x.shape
    cc = params["w1"].shape[-1]
    xn = x.reshape(b * s, w, c).astype(jnp.float32)

    def branch(k, wk, bias):
        xs = jnp.concatenate([xn[:, i:w - k + 1 + i, :] for i in range(k)], axis=-1)
        y = jnp.einsum("nlf,fo->nlo", xs, wk.reshape(k * c, cc)) + bias
        return jnp.max(jnp.maximum(y, 0.0), axis=1)

    o1 = branch(1, params["w1"], params["b1"])
    o2 = branch(2, params["w2"], params["b2"])
    o3 = branch(3, params["w3"], params["b3"])
    feats = jnp.concatenate([o1, o2, o3], axis=-1).reshape(b, s, 3 * cc)
    pooled = jnp.max(feats, axis=1)
    h = jnp.concatenate([pooled, ma.astype(jnp.float32)], axis=-1)
    h = jax.nn.sigmoid(h @ params["wl1"] + params["bl1"])
    return h @ params["wl2"] + params["bl2"]


# ---------------------------------------------------------------------------
if __name__ == "__main__":
    # Small shapes consistent with the module's forward():
    #   x:  [batch, seq_nums, words_nums, words_channels]
    #   ma: [batch, ma_feats]
    B, S, W, C = 2, 4, 16, 16
    CC, LC, MA, OUT = 64, 64, 8, 2   # conv_channel, linear_channel, ma_feats, out_channels

    key = jax.random.PRNGKey(0)
    kx, kma, kp = jax.random.split(key, 3)
    x = jax.random.normal(kx, (B, S, W, C), dtype=jnp.float32)
    ma = jax.random.normal(kma, (B, MA), dtype=jnp.float32)
    params = init_params(kp, C, CC, MA, LC, OUT)

    out = cnn_forward(x, ma, params)
    out = jax.block_until_ready(out)

    ref = ref_forward(x, ma, params)
    assert out.shape == (B, OUT), out.shape
    # bf16 conv inputs vs f32 reference -> loose-ish tolerance.
    if not jnp.allclose(out, ref, atol=3e-2, rtol=3e-2):
        raise AssertionError("Pallas output does not match JAX reference")

    print("KERNEL_OK")
</pallas_src>

<mosaic_0001>
module attributes {stable_mosaic.version = 11 : i64} {
  func.func @fused_kernel(%arg0: i32, %arg1: memref<1x64x48xbf16, #tpu.memory_space<vmem>>, %arg2: memref<48x384xbf16, #tpu.memory_space<vmem>>, %arg3: memref<1x384xf32, #tpu.memory_space<vmem>>, %arg4: memref<64x384xf32, #tpu.memory_space<vmem>>, %arg5: memref<1x1x8xf32, #tpu.memory_space<vmem>>, %arg6: memref<384x64xf32, #tpu.memory_space<vmem>>, %arg7: memref<8x64xf32, #tpu.memory_space<vmem>>, %arg8: memref<1x64xf32, #tpu.memory_space<vmem>>, %arg9: memref<64x2xf32, #tpu.memory_space<vmem>>, %arg10: memref<1x2xf32, #tpu.memory_space<vmem>>, %arg11: memref<1x1x2xf32, #tpu.memory_space<vmem>>) attributes {dimension_semantics = [#tpu.dimension_semantics<parallel>], iteration_bounds = array<i64: 2>, scalar_prefetch = 0 : i64, scratch_operands = 0 : i64, tpu.core_type = #tpu.core_type<tc>, window_params = [{transform_indices = @transform_0, window_bounds = array<i64: 1, 64, 48>}, {pipeline_mode = #tpu.pipeline_mode<synchronous>, transform_indices = @transform_1, window_bounds = array<i64: 48, 384>}, {pipeline_mode = #tpu.pipeline_mode<synchronous>, transform_indices = @transform_2, window_bounds = array<i64: 1, 384>}, {pipeline_mode = #tpu.pipeline_mode<synchronous>, transform_indices = @transform_3, window_bounds = array<i64: 64, 384>}, {transform_indices = @transform_4, window_bounds = array<i64: 1, 1, 8>}, {pipeline_mode = #tpu.pipeline_mode<synchronous>, transform_indices = @transform_5, window_bounds = array<i64: 384, 64>}, {pipeline_mode = #tpu.pipeline_mode<synchronous>, transform_indices = @transform_6, window_bounds = array<i64: 8, 64>}, {pipeline_mode = #tpu.pipeline_mode<synchronous>, transform_indices = @transform_7, window_bounds = array<i64: 1, 64>}, {pipeline_mode = #tpu.pipeline_mode<synchronous>, transform_indices = @transform_8, window_bounds = array<i64: 64, 2>}, {pipeline_mode = #tpu.pipeline_mode<synchronous>, transform_indices = @transform_9, window_bounds = array<i64: 1, 2>}, {transform_indices = @transform_10, window_bounds = array<i64: 1, 1, 2>}]} {
    %c0 = arith.constant 0 : index
    %c0_0 = arith.constant 0 : index
    %c0_1 = arith.constant 0 : index
    %0 = vector.load %arg1[%c0, %c0_0, %c0_1] : memref<1x64x48xbf16, #tpu.memory_space<vmem>>, vector<1x64x48xbf16>
    %1 = vector.shape_cast %0 : vector<1x64x48xbf16> to vector<64x48xbf16>
    %c0_2 = arith.constant 0 : index
    %c0_3 = arith.constant 0 : index
    %2 = vector.load %arg2[%c0_2, %c0_3] : memref<48x384xbf16, #tpu.memory_space<vmem>>, vector<48x384xbf16>
    %cst = arith.constant dense<0.000000e+00> : vector<64x384xf32>
    %3 = tpu.matmul %1, %2, %cst {dimension_numbers = #tpu.dot_dimension_numbers<[1], [0], [0], [1], [0, 0, 1, 1], [], []>} : vector<64x48xbf16>, vector<48x384xbf16>, vector<64x384xf32> -> vector<64x384xf32>
    %c0_4 = arith.constant 0 : index
    %c0_5 = arith.constant 0 : index
    %4 = vector.load %arg3[%c0_4, %c0_5] : memref<1x384xf32, #tpu.memory_space<vmem>>, vector<1x384xf32>
    %5 = vector.broadcast %4 : vector<1x384xf32> to vector<64x384xf32>
    %6 = arith.addf %3, %5 : vector<64x384xf32>
    %cst_6 = arith.constant 0.000000e+00 : f32
    %7 = vector.broadcast %cst_6 : f32 to vector<64x384xf32>
    %8 = arith.maximumf %6, %7 : vector<64x384xf32>
    %9 = vector.shape_cast %8 : vector<64x384xf32> to vector<1x64x384xf32>
    %c0_7 = arith.constant 0 : index
    %c0_8 = arith.constant 0 : index
    %10 = vector.load %arg4[%c0_7, %c0_8] : memref<64x384xf32, #tpu.memory_space<vmem>>, vector<64x384xf32>
    %11 = vector.shape_cast %10 : vector<64x384xf32> to vector<1x64x384xf32>
    %12 = arith.mulf %9, %11 : vector<1x64x384xf32>
    %cst_9 = arith.constant dense<0xFF800000> : vector<1x384xf32>
    %13 = vector.multi_reduction <maximumf>, %12, %cst_9 [1] : vector<1x64x384xf32> to vector<1x384xf32>
    %c0_10 = arith.constant 0 : index
    %c0_11 = arith.constant 0 : index
    %c0_12 = arith.constant 0 : index
    %14 = vector.load %arg5[%c0_10, %c0_11, %c0_12] : memref<1x1x8xf32, #tpu.memory_space<vmem>>, vector<1x1x8xf32>
    %15 = vector.shape_cast %14 : vector<1x1x8xf32> to vector<1x8xf32>
    %c0_13 = arith.constant 0 : index
    %c0_14 = arith.constant 0 : index
    %16 = vector.load %arg6[%c0_13, %c0_14] : memref<384x64xf32, #tpu.memory_space<vmem>>, vector<384x64xf32>
    %cst_15 = arith.constant dense<0.000000e+00> : vector<1x64xf32>
    %17 = tpu.matmul %13, %16, %cst_15 {dimension_numbers = #tpu.dot_dimension_numbers<[1], [0], [0], [1], [0, 0, 1, 1], [], []>} : vector<1x384xf32>, vector<384x64xf32>, vector<1x64xf32> -> vector<1x64xf32>
    %c0_16 = arith.constant 0 : index
    %c0_17 = arith.constant 0 : index
    %18 = vector.load %arg7[%c0_16, %c0_17] : memref<8x64xf32, #tpu.memory_space<vmem>>, vector<8x64xf32>
    %cst_18 = arith.constant dense<0.000000e+00> : vector<1x64xf32>
    %19 = tpu.matmul %15, %18, %cst_18 {dimension_numbers = #tpu.dot_dimension_numbers<[1], [0], [0], [1], [0, 0, 1, 1], [], []>} : vector<1x8xf32>, vector<8x64xf32>, vector<1x64xf32> -> vector<1x64xf32>
    %20 = arith.addf %17, %19 : vector<1x64xf32>
    %c0_19 = arith.constant 0 : index
    %c0_20 = arith.constant 0 : index
    %21 = vector.load %arg8[%c0_19, %c0_20] : memref<1x64xf32, #tpu.memory_space<vmem>>, vector<1x64xf32>
    %22 = arith.addf %20, %21 : vector<1x64xf32>
    %23 = arith.negf %22 : vector<1x64xf32>
    %24 = math.exp %23 : vector<1x64xf32>
    %cst_21 = arith.constant 1.000000e+00 : f32
    %25 = vector.broadcast %cst_21 : f32 to vector<1x64xf32>
    %26 = arith.addf %25, %24 : vector<1x64xf32>
    %27 = arith.divf %25, %26 : vector<1x64xf32>
    %c0_22 = arith.constant 0 : index
    %c0_23 = arith.constant 0 : index
    %28 = vector.load %arg9[%c0_22, %c0_23] : memref<64x2xf32, #tpu.memory_space<vmem>>, vector<64x2xf32>
    %cst_24 = arith.constant dense<0.000000e+00> : vector<1x2xf32>
    %29 = tpu.matmul %27, %28, %cst_24 {dimension_numbers = #tpu.dot_dimension_numbers<[1], [0], [0], [1], [0, 0, 1, 1], [], []>} : vector<1x64xf32>, vector<64x2xf32>, vector<1x2xf32> -> vector<1x2xf32>
    %c0_25 = arith.constant 0 : index
    %c0_26 = arith.constant 0 : index
    %30 = vector.load %arg10[%c0_25, %c0_26] : memref<1x2xf32, #tpu.memory_space<vmem>>, vector<1x2xf32>
    %31 = arith.addf %29, %30 : vector<1x2xf32>
    %32 = vector.shape_cast %31 : vector<1x2xf32> to vector<1x1x2xf32>
    %c0_27 = arith.constant 0 : index
    %c0_28 = arith.constant 0 : index
    %c0_29 = arith.constant 0 : index
    %33 = vector.load %arg11[%c0_27, %c0_28, %c0_29] : memref<1x1x2xf32, #tpu.memory_space<vmem>>, vector<1x1x2xf32>
    tpu.vector_store %arg11[%c0_27, %c0_28, %c0_29], %32 {strides = array<i32>} : memref<1x1x2xf32, #tpu.memory_space<vmem>>, vector<1x1x2xf32>,
    return
  }
  func.func @transform_0(%arg0: i32) -> (i32, i32, i32) {
    %c0_i32 = arith.constant 0 : i32
    %c0_i32_0 = arith.constant 0 : i32
    %c0_i32_1 = arith.constant 0 : i32
    return %arg0, %c0_i32, %c0_i32_0 : i32, i32, i32
  }
  func.func @transform_1(%arg0: i32) -> (i32, i32) {
    %c0_i32 = arith.constant 0 : i32
    %c0_i32_0 = arith.constant 0 : i32
    %c0_i32_1 = arith.constant 0 : i32
    return %c0_i32, %c0_i32_0 : i32, i32
  }
  func.func @transform_2(%arg0: i32) -> (i32, i32) {
    %c0_i32 = arith.constant 0 : i32
    %c0_i32_0 = arith.constant 0 : i32
    %c0_i32_1 = arith.constant 0 : i32
    return %c0_i32, %c0_i32_0 : i32, i32
  }
  func.func @transform_3(%arg0: i32) -> (i32, i32) {
    %c0_i32 = arith.constant 0 : i32
    %c0_i32_0 = arith.constant 0 : i32
    %c0_i32_1 = arith.constant 0 : i32
    return %c0_i32, %c0_i32_0 : i32, i32
  }
  func.func @transform_4(%arg0: i32) -> (i32, i32, i32) {
    %c0_i32 = arith.constant 0 : i32
    %c0_i32_0 = arith.constant 0 : i32
    %c0_i32_1 = arith.constant 0 : i32
    return %arg0, %c0_i32, %c0_i32_0 : i32, i32, i32
  }
  func.func @transform_5(%arg0: i32) -> (i32, i32) {
    %c0_i32 = arith.constant 0 : i32
    %c0_i32_0 = arith.constant 0 : i32
    %c0_i32_1 = arith.constant 0 : i32
    return %c0_i32, %c0_i32_0 : i32, i32
  }
  func.func @transform_6(%arg0: i32) -> (i32, i32) {
    %c0_i32 = arith.constant 0 : i32
    %c0_i32_0 = arith.constant 0 : i32
    %c0_i32_1 = arith.constant 0 : i32
    return %c0_i32, %c0_i32_0 : i32, i32
  }
  func.func @transform_7(%arg0: i32) -> (i32, i32) {
    %c0_i32 = arith.constant 0 : i32
    %c0_i32_0 = arith.constant 0 : i32
    %c0_i32_1 = arith.constant 0 : i32
    return %c0_i32, %c0_i32_0 : i32, i32
  }
  func.func @transform_8(%arg0: i32) -> (i32, i32) {
    %c0_i32 = arith.constant 0 : i32
    %c0_i32_0 = arith.constant 0 : i32
    %c0_i32_1 = arith.constant 0 : i32
    return %c0_i32, %c0_i32_0 : i32, i32
  }
  func.func @transform_9(%arg0: i32) -> (i32, i32) {
    %c0_i32 = arith.constant 0 : i32
    %c0_i32_0 = arith.constant 0 : i32
    %c0_i32_1 = arith.constant 0 : i32
    return %c0_i32, %c0_i32_0 : i32, i32
  }
  func.func @transform_10(%arg0: i32) -> (i32, i32, i32) {
    %c0_i32 = arith.constant 0 : i32
    %c0_i32_0 = arith.constant 0 : i32
    %c0_i32_1 = arith.constant 0 : i32
    return %arg0, %c0_i32, %c0_i32_0 : i32, i32, i32
  }
}

</mosaic_0001>

<bundles_post_ra>
// kernel: tpu_custom_call.1
= control target key start
LH: loop header
LB: loop body
LE: loop exit
PB: predicated region body
PF: predicated region fallthrough
CT: control target
= control target key end

     0   :  { %15 = vsyncpa [#allocation3], 0  ;;  %s2063_s0 = inlined_call_operand.vmem [shape: bf16[2,64,48], index: 0, kind: input, shape index: {}]   ;;  %s2064_s1 = inlined_call_operand.vmem [shape: bf16[48,384], index: 1, kind: input, shape index: {}]   ;;  %s2065_s2 = inlined_call_operand.vmem [shape: f32[1,384], index: 2, kind: input, shape index: {}]   ;;  %s2066_s3 = inlined_call_operand.vmem [shape: f32[64,384], index: 3, kind: input, shape index: {}]   ;;  %s2067_s4 = inlined_call_operand.vmem [shape: f32[2,1,8], index: 4, kind: input, shape index: {}]   ;;  %s2068_s5 = inlined_call_operand.vmem [shape: f32[384,64], index: 5, kind: input, shape index: {}]   ;;  %s2069_s6 = inlined_call_operand.vmem [shape: f32[8,64], index: 6, kind: input, shape index: {}]   ;;  %s2070_s7 = inlined_call_operand.vmem [shape: f32[1,64], index: 7, kind: input, shape index: {}]   ;;  %s2071_s8 = inlined_call_operand.vmem [shape: f32[64,2], index: 8, kind: input, shape index: {}]   ;;  %s2072_s9 = inlined_call_operand.vmem [shape: f32[1,2], index: 9, kind: input, shape index: {}]   ;;  %s2073_s10 = inlined_call_operand.hbm [shape: f32[2,1,2], index: 10, kind: output, shape index: {}]  }
   0x1   :  { %17 = vsyncpa [#allocation3 + $0x1], 0  ;;  %s1605_s13 = smov 0   ;;  %s1607_s14 = smov 0  }
   0x2   :  { %s1609_s15 = smov 0   ;;  %s1611_s16 = smov 0  }
   0x3 LB: > { %s1626_s17 = sadd.s32 4294967295, %s1543_s16   ;;  %s1173_s18 = sadd.s32 4294967294, %s1543_s16   ;;  %s1543_s16 = sphi %s1611_s16, %s2081_s16   ;;  %s1539_s15 = sphi %s1609_s15, %s2080_s15   ;;  %s1535_s14 = sphi %s1607_s14, %s2079_s14   ;;  %s1531_s13 = sphi %s1605_s13, %s2078_s13  }
   0x4   : > { %s1630_s19 = sadd.s32 1, %s1543_s16   ;;  %s250_s20 = sadd.s32 1, %s1539_s15 }
   0x5   : > { %s247_s21 = ssub.s32 %s1543_s16, %s1630_s19  ;;  %p260_p0 = scmp.ne.s32.totalorder %s1539_s15, %s1535_s14 }
   0x6   : > { %p248_p1 = scmp.eq.s32.totalorder %s247_s21, 0  ;;  %p261_p2 = scmp.eq.s32.totalorder %s1626_s17, 1 }
   0x7   : > { %p266_p3 = scmp.ne.s32.totalorder %s1535_s14, %s1531_s13  ;;  %p267_p4 = scmp.eq.s32.totalorder %s1173_s18, 1 }
   0x8   : > { %s1641_s22 = scalar_select %p248_p1, %s1539_s15, %s250_s20  }
   0x9   : > { %p1643_p5 = por %p261_p2, %p260_p0  ;;  %p1647_p6 = por %p267_p4, %p266_p3 }
   0xa   : > { %2074 = sst [smem:[#allocation5_spill]] %s1641_s22  ;;  %p1176_p7 = scmp.ge.s32.totalorder %s1543_s16, 1 }
   0xb   : > { %p323_p8 = scmp.lt.s32.totalorder %s1543_s16, 3 }
   0xd   : > { %p324_p9 = pnand %p1176_p7, %p323_p8 }
   0xe   : > { %v1461_v0 = vld [vmem:[%s2064_s1 + $0x4] ss:$12 sps:$4 sm:$0xff] (!%p324_p9)   ;;  %p363_p10 = scmp.lt.s32.totalorder (!%p324_p9), %s1626_s17, 1  ;;  %v1463_v1 = vld [vmem:[%s2064_s1] ss:$12 sps:$4 sm:$0xff] (!%p324_p9)   ;;  %v1545_v2 = vmov (!%p324_p9), 0  }
   0xf   : > { %327 = sbr.rel (%p324_p9) target bundleno = 764 (0x2fc), region = 60  ;;  %522 = vmatprep.mubr.bf16.mxu0 (!%p324_p9), %v1545_v2  ;;  %490 = vmatprep.subr.bf16.mxu0 (!%p324_p9), %v1461_v0  ;;  %v1464_v3 = vld [vmem:[%s2064_s1 + $0x1c] ss:$12 sps:$4 sm:$0xff] (!%p324_p9)   ;;  %v1467_v5 = vld [vmem:[%s2064_s1 + $0x18] ss:$12 sps:$4 sm:$0xff] (!%p324_p9)   ;;  %vm477_vm0 = vcmask (!%p324_p9), 392192  }
  0x10   : > { %491 = vmatpush1.bf16.msra.mxu0 (!%p324_p9), %v1463_v1  ;;  %v1466_v4 = vld [vmem:[%s2064_s1 + $0x8] ss:$12 sps:$4 sm:$0xff] (!%p324_p9)   ;;  %v1470_v7 = vld [vmem:[%s2064_s1 + $0x20] ss:$12 sps:$4 sm:$0xff] (!%p324_p9)   ;;  %v1471_v8 = vld [vmem:[%s2064_s1 + $0x30] ss:$12 sps:$4 sm:$0xff] (!%p324_p9)  }
  0x11   : > { %492 = vmatprep.subr.bf16.mxu0 (!%p324_p9), %v1464_v3  ;;  %v1468_v6 = vld [vmem:[%s2064_s1 + $0x34] ss:$12 sps:$4 sm:$0xff] (!%p324_p9)   ;;  %1277 = vmatprep.subr.bf16.mxu1 (!%p324_p9), %v1466_v4  ;;  %v1473_v9 = vld [vmem:[%s2064_s1 + $0x38] ss:$12 sps:$4 sm:$0xff] (!%p324_p9)   ;;  %v1546_v14 = vmov (!%p324_p9), 0.0   ;;  %v773_v17 = vld [vmem:[%s2068_s5 + $0x108] sm:$0xff] (!%p324_p9) }
  0x12   : > { %1278 = vmatpush3.bf16.msra.mxu1 (!%p324_p9), %v1466_v4  ;;  %v788_v15 = vld [vmem:[%s2069_s6] sm:$0xff] (!%p324_p9)  ;;  %vm1547_vm1 = vmmov (!%p324_p9), 0   ;;  %v1548_v18 = vmov (!%p324_p9), 0.0|0.0   ;;  %vm789_vm2 = vcmask (!%p324_p9), 64512   ;;  %v774_v21 = vld [vmem:[%s2068_s5 + $0x110] sm:$0xff] (!%p324_p9)  ;;  %v775_v22 = vld [vmem:[%s2068_s5 + $0x118] sm:$0xff] (!%p324_p9) }
  0x13   : > { %1279 = vmatprep.subr.bf16.mxu1 (!%p324_p9), %v1470_v7  ;;  %v772_v16 = vld [vmem:[%s2068_s5 + $0x100] sm:$0xff] (!%p324_p9)  ;;  %v1386_v23 = vpack.c.bf16 (!%p324_p9), %v775_v22, %v774_v21  ;;  %v777_v25 = vld [vmem:[%s2068_s5 + $0x128] sm:$0xff] (!%p324_p9)  ;;  %v778_v33 = vld [vmem:[%s2068_s5 + $0x130] sm:$0xff] (!%p324_p9)  ;;  %vm1020_vm3 = vcmask (!%p324_p9), 523264   ;;  %s361_s26 = sand.u32 (!%p324_p9), 1, %s1535_s14   ;;  %vm1094_vm4 = vcmask (!%p324_p9), 8192  }
  0x14   : > { %493 = vmatpush1.bf16.msra.mxu0 (!%p324_p9), %v1467_v5  ;;  %v1383_v20 = vpack.c.bf16 (!%p324_p9), %v773_v17, %v772_v16  ;;  %v776_v24 = vld [vmem:[%s2068_s5 + $0x120] sm:$0xff] (!%p324_p9)  ;;  %v757_v28 = vld [vmem:[%s2068_s5 + $0x88] sm:$0xff] (!%p324_p9)  ;;  %v779_v34 = vld [vmem:[%s2068_s5 + $0x138] sm:$0xff] (!%p324_p9)  ;;  %s362_s30 = scalar_lea.vmem (!%p324_p9), [#allocation2], %s361_s26  ;;  %s1097_s25 = scalar_lea.sflag (!%p324_p9), [#allocation3], %s361_s26 }
  0x15   : > { %494 = vmatprep.subr.bf16.mxu0 (!%p324_p9), %v1468_v6  ;;  %v1389_v26 = vpack.c.bf16 (!%p324_p9), %v777_v25, %v776_v24  ;;  %v756_v27 = vld [vmem:[%s2068_s5 + $0x80] sm:$0xff] (!%p324_p9)  ;;  %v741_v31 = vld [vmem:[%s2068_s5 + $0x8] sm:$0xff] (!%p324_p9)  ;;  %v1392_v35 = vpack.c.bf16 (!%p324_p9), %v779_v34, %v778_v33  ;;  %v758_v36 = vld [vmem:[%s2068_s5 + $0x90] sm:$0xff] (!%p324_p9) }
  0x16   : > { %s1670_s21 = scalar_select %p363_p10, %s1626_s17, 1  ;;  %1280 = vmatpush3.bf16.msra.mxu1 %v1470_v7  ;;  %v1350_v29 = vpack.c.bf16 %v757_v28, %v756_v27  ;;  %v740_v30 = vld [vmem:[%s2068_s5] sm:$0xff]  ;;  %v759_v37 = vld [vmem:[%s2068_s5 + $0x98] sm:$0xff]  ;;  %v742_v39 = vld [vmem:[%s2068_s5 + $0x10] sm:$0xff]  ;;  %v394_v28 = vlaneseq }
  0x17   : > { %1281 = vmatprep.subr.bf16.mxu1 %v1473_v9  ;;  %v1352_v32 = vpack.c.bf16 %v741_v31, %v740_v30  ;;  %v1354_v38 = vpack.c.bf16 %v759_v37, %v758_v36  ;;  %v743_v40 = vld [vmem:[%s2068_s5 + $0x18] sm:$0xff]  ;;  %v780_v41 = vld [vmem:[%s2068_s5 + $0x140] sm:$0xff]  ;;  %v781_v43 = vld [vmem:[%s2068_s5 + $0x148] sm:$0xff] }
  0x18   : > { %s1206_s29 = sshll.u32 %s1670_s21, 5  ;;  %495 = vmatpush1.bf16.msra.mxu0 %v1471_v8  ;;  %s370_s11 = scalar_lea.vmem %s2067_s4, %s1670_s21  ;;  %v1356_v42 = vpack.c.bf16 %v743_v40, %v742_v39  ;;  %v1395_v44 = vpack.c.bf16 %v781_v43, %v780_v41  ;;  %v760_v45 = vld [vmem:[%s2068_s5 + $0xa0] sm:$0xff]  ;;  %v761_v46 = vld [vmem:[%s2068_s5 + $0xa8] sm:$0xff]  ;;  %v782_v51 = vld [vmem:[%s2068_s5 + $0x150] sm:$0xff] }
  0x19   : > { %s367_s20 = scalar_lea.vmem %s2063_s0, %s1206_s29  ;;  %v739_v19 = vld [vmem:[%s370_s11] sm:$0x1]  ;;  %1351 = vmatprep.subr.bf16.mxu0 %v1350_v29  ;;  %v1358_v47 = vpack.c.bf16 %v761_v46, %v760_v45  ;;  %v745_v49 = vld [vmem:[%s2068_s5 + $0x28] sm:$0xff]  ;;  %v783_v52 = vld [vmem:[%s2068_s5 + $0x158] sm:$0xff]  ;;  %v395_v29 = vshrl.u32 %v394_v28, 7  ;;  %s1203_s29 = sshll.u32 %s1626_s17, 4 }
  0x1a   : > { %v1472_v10 = vld [vmem:[%s367_s20] sm:$0xff]   ;;  %v1474_v11 = vld [vmem:[%s367_s20 + $0x8] sm:$0xff]   ;;  %1282 = vmatpush3.bf16.msra.mxu1 %v1473_v9  ;;  %v1475_v12 = vld [vmem:[%s367_s20 + $0x10] sm:$0xff]   ;;  %v1398_v53 = vpack.c.bf16 %v783_v52, %v782_v51  ;;  %s1109_s11 = sshll.u32 %s362_s30, 4  ;;  %s1549_s17 = smov [#allocation2]   ;;  %s2023_s11 = int_to_ptr.vmem [resolvable:$true] %s1109_s11 }
  0x1b   : > { %1283 = vmatprep.mubr.msk.bf16.mxu1 %vm477_vm0, %v1472_v10  ;;  %1192 = vmatmul.mubr.msk.bf16.vlgmr.msra.gmra.mrb[0].mxu0 %vm477_vm0, %v1472_v10  ;;  %v1476_v13 = vld [vmem:[%s367_s20 + $0x18] sm:$0xff]   ;;  %v744_v48 = vld [vmem:[%s2068_s5 + $0x20] sm:$0xff]  ;;  %v762_v54 = vld [vmem:[%s2068_s5 + $0xb0] sm:$0xff]  ;;  %v396_v30 = vsub.s32 0, %v395_v29  ;;  %v404_v33 = vsub.s32 2, %v395_v29  ;;  %s2021_s20 = scalar_lea.hbm %s2073_s10, %s1203_s29  ;;  %s1481_s21 = scalar_lea.vmem %s2023_s11, 16 }
  0x1c   : > { %532 = vmatprep.mubr.bf16.mxu0 %v1545_v2  ;;  %1291 = vmatprep.subr.mxu1 %v1546_v14  ;;  %v1360_v50 = vpack.c.bf16 %v745_v49, %v744_v48  ;;  %v763_v55 = vld [vmem:[%s2068_s5 + $0xb8] sm:$0xff]  ;;  %v746_v57 = vld [vmem:[%s2068_s5 + $0x30] sm:$0xff]  ;;  %v784_v60 = vld [vmem:[%s2068_s5 + $0x160] sm:$0xff]  ;;  %p1482_p11 = scmp.ne.s32.totalorder %s2023_s11, %s1481_s21  ;;  %s1485_s22 = sshll.u32 %s1549_s17, 4  ;;  %s1486_s22 = int_to_ptr.vmem [resolvable:$false] %s1485_s22 }
  0x1d   : > { %1284 = vmatmul.mubr.msk.bf16.vlgmr.msra.gmra.mrb[0].mxu1 %vm477_vm0, %v1474_v11  ;;  %1353 = vmatpush3.bf16.msra.mxu0 %v1352_v32  ;;  %v1362_v56 = vpack.c.bf16 %v763_v55, %v762_v54  ;;  %v747_v58 = vld [vmem:[%s2068_s5 + $0x38] sm:$0xff]  ;;  %v785_v61 = vld [vmem:[%s2068_s5 + $0x168] sm:$0xff]  ;;  %v764_v63 = vld [vmem:[%s2068_s5 + $0xc0] sm:$0xff]  ;;  %v400_v32 = vsub.s32 1, %v395_v29  ;;  %s1487_s27 = scalar_lea.vmem %s1486_s22, 32  ;;  %p1488_p0 = scmp.lt.s32.totalorder %s2023_s11, %s1486_s22 }
  0x1e   : > { %1287 = vmatprep.mubr.msk.bf16.mxu1 %vm477_vm0, %v1475_v12  ;;  %1292 = vmatpush3.msra.mxu1 %v788_v15  ;;  %v1364_v59 = vpack.c.bf16 %v747_v58, %v746_v57  ;;  %v1401_v62 = vpack.c.bf16 %v785_v61, %v784_v60  ;;  %v765_v0 = vld [vmem:[%s2068_s5 + $0xc8] sm:$0xff]  ;;  %v786_v5 = vld [vmem:[%s2068_s5 + $0x170] sm:$0xff]  ;;  %v787_v6 = vld [vmem:[%s2068_s5 + $0x178] sm:$0xff]  ;;  %p1483_p12 = pnand %p1482_p11, %p1643_p5  ;;  %p1489_p1 = scmp.lt.s32.totalorder %s1487_s27, %s1481_s21 }
  0x1f   : > { %1382 = vmatprep.subr.bf16.mxu1 %v1548_v18  ;;  %1355 = vmatprep.subr.bf16.mxu0 %v1354_v38  ;;  %v1366_v1 = vpack.c.bf16 %v765_v0, %v764_v63  ;;  %v749_v3 = vld [vmem:[%s2068_s5 + $0x48] sm:$0xff]  ;;  %v1404_v7 = vpack.c.bf16 %v787_v6, %v786_v5  ;;  %v766_v8 = vld [vmem:[%s2068_s5 + $0xd0] sm:$0xff]  ;;  %v767_v9 = vld [vmem:[%s2068_s5 + $0xd8] sm:$0xff] }
  0x20   : > { %v1370_v10 = vpack.c.bf16 %v767_v9, %v766_v8  ;;  %v768_v15 = vld [vmem:[%s2068_s5 + $0xe0] sm:$0xff]  ;;  %v769_v16 = vld [vmem:[%s2068_s5 + $0xe8] sm:$0xff]  ;;  %v770_v22 = vld [vmem:[%s2068_s5 + $0xf0] sm:$0xff]  ;;  %p1484_p13 = pneg %p1483_p12  ;;  %p1490_p2 = por %p1489_p1, %p1488_p0 }
  0x21   : > { %1357 = vmatpush3.bf16.msra.mxu0 %v1356_v42  ;;  %v1374_v17 = vpack.c.bf16 %v769_v16, %v768_v15  ;;  %v754_v25 = vld [vmem:[%s2068_s5 + $0x70] sm:$0xff]  ;;  %v392_v31 = vld [vmem:[%s2065_s2] sm:$0x7]  ;;  %v655_v60 = vld [vmem:[%s2066_s3 + $0x18] sm:$0xff] }
  0x22   : > { %1359 = vmatprep.subr.bf16.mxu0 %v1358_v47  ;;  %v1864_v34 = vrot.slane %v392_v31, %v396_v30  ;;  %v1868_v37 = vrot.slane %v392_v31, %v404_v33  ;;  %v660_v49 = vld [vmem:[%s2066_s3 + $0x40] sm:$0xff]  ;;  %v661_v28 = vld [vmem:[%s2066_s3 + $0x48] sm:$0xff]  ;;  %p1491_p3 = pnand %p1490_p2, %p1484_p13 }
  0x23   : > { %1193 = vmatmul.mubr.msk.bf16.gmra.mrb[4].mxu0 %vm477_vm0, %v1474_v11  ;;  %v750_v11 = vld [vmem:[%s2068_s5 + $0x50] sm:$0xff]  ;;  %v652_v52 = vld [vmem:[%s2066_s3] sm:$0xff] }
  0x24   : > { %542 = vmatprep.mubr.bf16.mxu0 %v1545_v2  ;;  %v656_v6 = vld [vmem:[%s2066_s3 + $0x20] sm:$0xff] }
  0x25   : > { %1288 = vmatmul.mubr.msk.bf16.gmra.mrb[4].mxu1 %vm477_vm0, %v1476_v13  ;;  %1361 = vmatpush3.bf16.msra.mxu0 %v1360_v50 }
  0x26   : > { %1293 = vmatprep.mubr.msk.f32.mxu1 %vm1547_vm1, %v1546_v14  ;;  %1363 = vmatprep.subr.bf16.mxu0 %v1362_v56  ;;  %v654_v56 = vld [vmem:[%s2066_s3 + $0x10] sm:$0xff] }
  0x29   : > { %1365 = vmatpush3.bf16.msra.mxu0 %v1364_v59  ;;  %v653_v59 = vld [vmem:[%s2066_s3 + $0x8] sm:$0xff] }
  0x2a   : > { %1367 = vmatprep.subr.bf16.mxu0 %v1366_v1 }
  0x2b   : > { %1194 = vmatmul.mubr.msk.bf16.gmra.mrb[8].mxu0 %vm477_vm0, %v1475_v12  ;;  %v751_v12 = vld [vmem:[%s2068_s5 + $0x58] sm:$0xff] }
  0x2c   : > { %552 = vmatprep.mubr.bf16.mxu0 %v1545_v2  ;;  %v748_v2 = vld [vmem:[%s2068_s5 + $0x40] sm:$0xff] }
  0x2d   : > { %1294 = vmatmul.mubr.msk.f32.vlgmr.msra.gmra.mrb[8].mxu1 %vm789_vm2, %v739_v19  ;;  %v1368_v4 = vpack.c.bf16 %v749_v3, %v748_v2  ;;  %v752_v19 = vld [vmem:[%s2068_s5 + $0x60] sm:$0xff] }
  0x2e   : > { %1384 = vmatpush3.bf16.msra.mxu1 %v1383_v20  ;;  %1328 = vmatprep.mubr.msk.f32.mxu1 %vm1547_vm1, %v1546_v14  ;;  %v753_v20 = vld [vmem:[%s2068_s5 + $0x68] sm:$0xff] }
  0x2f   : > { %1385 = vmatprep.subr.bf16.mxu1 %v1548_v18  ;;  %1369 = vmatpush3.bf16.msra.mxu0 %v1368_v4  ;;  %v1376_v21 = vpack.c.bf16 %v753_v20, %v752_v19  ;;  %v657_v4 = vld [vmem:[%s2066_s3 + $0x28] sm:$0xff]  ;;  %v659_v20 = vld [vmem:[%s2066_s3 + $0x38] sm:$0xff] }
  0x30   : > { %1371 = vmatprep.subr.bf16.mxu0 %v1370_v10 }
  0x32   : > { %1387 = vmatpush3.bf16.msra.mxu1 %v1386_v23  ;;  %v771_v23 = vld [vmem:[%s2068_s5 + $0xf8] sm:$0xff] }
  0x33   : > { %1195 = vmatmul.mubr.msk.bf16.gmra.mrb[12].mxu0 %vm477_vm0, %v1476_v13  ;;  %1388 = vmatprep.subr.bf16.mxu1 %v1548_v18  ;;  %v1372_v13 = vpack.c.bf16 %v751_v12, %v750_v11  ;;  %v1378_v24 = vpack.c.bf16 %v771_v23, %v770_v22 }
  0x35   : > { %1373 = vmatpush3.bf16.msra.mxu0 %v1372_v13  ;;  %v658_v13 = vld [vmem:[%s2066_s3 + $0x30] sm:$0xff] }
  0x36   : > { %1390 = vmatpush3.bf16.msra.mxu1 %v1389_v26  ;;  %1375 = vmatprep.subr.bf16.mxu0 %v1374_v17  ;;  %v755_v26 = vld [vmem:[%s2068_s5 + $0x78] sm:$0xff] }
  0x37   : > { %1391 = vmatprep.subr.bf16.mxu1 %v1548_v18  ;;  %v1380_v27 = vpack.c.bf16 %v755_v26, %v754_v25 }
  0x39   : > { %1377 = vmatpush3.bf16.msra.mxu0 %v1376_v21 }
  0x3a   : > { %1393 = vmatpush3.bf16.msra.mxu1 %v1392_v35  ;;  %1379 = vmatprep.subr.bf16.mxu0 %v1378_v24  ;;  %v1866_v35 = vrot.slane %v392_v31, %v400_v32 }
  0x3b   : > { %1394 = vmatprep.subr.bf16.mxu1 %v1548_v18 }
  0x3d   : > { %1381 = vmatpush3.bf16.msra.mxu0 %v1380_v27 }
  0x3e   : > { %1396 = vmatpush3.bf16.msra.mxu1 %v1395_v44  ;;  %1406 = vmatprep.subr.bf16.mxu0 %v1548_v18 }
  0x3f   : > { %1397 = vmatprep.subr.bf16.mxu1 %v1548_v18 }
  0x42   : > { %1399 = vmatpush3.bf16.msra.mxu1 %v1398_v53 }
  0x43   : > { %1400 = vmatprep.subr.bf16.mxu1 %v1548_v18 }
  0x46   : > { %1402 = vmatpush3.bf16.msra.mxu1 %v1401_v62  ;;  %v663_v62 = vld [vmem:[%s2066_s3 + $0x58] sm:$0xff] }
  0x47   : > { %1403 = vmatprep.subr.bf16.mxu1 %v1548_v18 }
  0x4a   : > { %1405 = vmatpush3.bf16.msra.mxu1 %v1404_v7 }
  0xee   : > { %v524_v36 = vpop.f32.mrb[0].mxu0 }
  0xef   : > { %v525_v38 = vadd.f32 %v524_v36, %v1864_v34  ;;  %v526_v39 = vpop.f32.mrb[1].mxu0  ;;  %v662_v36 = vld [vmem:[%s2066_s3 + $0x50] sm:$0xff] }
  0xf0   : > { %v527_v40 = vadd.f32 %v526_v39, %v1866_v35  ;;  %v528_v41 = vpop.f32.mrb[2].mxu0  ;;  %v1285_v44 = vpop.f32.mrb[0].mxu1  ;;  %v672_v39 = vld [vmem:[%s2066_s3 + $0xa0] sm:$0xff] }
  0xf1   : > { %v529_v42 = vadd.f32 %v528_v41, %v1864_v34  ;;  %v530_v43 = vpop.f32.mrb[3].mxu0  ;;  %v606_v46 = vadd.f32 %v1285_v44, %v1868_v37  ;;  %v597_v47 = vpop.f32.mrb[1].mxu1  ;;  %v628_v48 = vmax.f32 %v525_v38, 0.0 }
  0xf2   : > { %v531_v45 = vadd.f32 %v530_v43, %v1866_v35  ;;  %v598_v50 = vadd.f32 %v597_v47, %v1868_v37  ;;  %v1286_v51 = vpop.f32.mrb[2].mxu1  ;;  %v629_v53 = vmax.f32 %v527_v40, 0.0 }
  0xf3   : > { %v631_v54 = vmax.f32 %v529_v42, 0.0  ;;  %v636_v55 = vmax.f32 %v606_v46, 0.0  ;;  %v609_v57 = vadd.f32 %v1286_v51, %v1868_v37  ;;  %v600_v58 = vpop.f32.mrb[3].mxu1  ;;  %v1901_v5 = vmul.f32 %v652_v52, %v628_v48  ;;  %v675_v51 = vld [vmem:[%s2066_s3 + $0xb8] sm:$0xff] }
  0xf4   : > { %v630_v61 = vmax.f32 %v598_v50, 0.0  ;;  %v601_v63 = vadd.f32 %v600_v58, %v1868_v37  ;;  %v632_v0 = vmax.f32 %v531_v45, 0.0  ;;  %v1907_v11 = vmul.f32 %v653_v59, %v629_v53  ;;  %v666_v45 = vld [vmem:[%s2066_s3 + $0x70] sm:$0xff] }
  0xf5   : > { %v1896_v2 = vmul.f32 %v660_v49, %v636_v55  ;;  %v639_v3 = vmax.f32 %v609_v57, 0.0  ;;  %v1909_v12 = vmul.f32 %v655_v60, %v631_v54  ;;  %v669_v57 = vld [vmem:[%s2066_s3 + $0x88] sm:$0xff] }
  0xf6   : > { %v534_v1 = vpop.f32.mrb[4].mxu0  ;;  %v678_v9 = vmul.f32 %v654_v56, %v630_v61  ;;  %v633_v10 = vmax.f32 %v601_v63, 0.0  ;;  %v1920_v26 = vmul.f32 %v656_v6, %v632_v0 }
  0xf7   : > { %v535_v7 = vadd.f32 %v534_v1, %v1864_v34  ;;  %v536_v8 = vpop.f32.mrb[5].mxu0  ;;  %v687_v17 = vmul.f32 %v663_v62, %v639_v3  ;;  %v664_v1 = vld [vmem:[%s2066_s3 + $0x60] sm:$0xff] }
  0xf8   : > { %v537_v15 = vadd.f32 %v536_v8, %v1866_v35  ;;  %v538_v16 = vpop.f32.mrb[6].mxu0  ;;  %v726_v21 = vmax.f32 %v678_v9, %v1896_v2  ;;  %v681_v24 = vmul.f32 %v657_v4, %v633_v10  ;;  %v1289_v25 = vpop.f32.mrb[4].mxu1 }
  0xf9   : > { %v634_v19 = vmax.f32 %v535_v7, 0.0  ;;  %v539_v22 = vadd.f32 %v538_v16, %v1864_v34  ;;  %v540_v23 = vpop.f32.mrb[7].mxu0  ;;  %v622_v30 = vadd.f32 %v1289_v25, %v1868_v37  ;;  %v613_v31 = vpop.f32.mrb[5].mxu1  ;;  %v665_v7 = vld [vmem:[%s2066_s3 + $0x68] sm:$0xff] }
  0xfa   : > { %v635_v27 = vmax.f32 %v537_v15, 0.0  ;;  %v541_v29 = vadd.f32 %v540_v23, %v1866_v35  ;;  %v727_v38 = vmax.f32 %v681_v24, %v687_v17  ;;  %v614_v40 = vadd.f32 %v613_v31, %v1868_v37  ;;  %v1290_v41 = vpop.f32.mrb[6].mxu1 }
  0xfb   : > { %v682_v32 = vmul.f32 %v658_v13, %v634_v19  ;;  %v637_v33 = vmax.f32 %v539_v22, 0.0  ;;  %v648_v44 = vmax.f32 %v622_v30, 0.0  ;;  %v625_v46 = vadd.f32 %v1290_v41, %v1868_v37  ;;  %v616_v47 = vpop.f32.mrb[7].mxu1  ;;  %v668_v19 = vld [vmem:[%s2066_s3 + $0x80] sm:$0xff]  ;;  %v671_v41 = vld [vmem:[%s2066_s3 + $0x98] sm:$0xff] }
  0xfc   : > { %v683_v42 = vmul.f32 %v659_v20, %v635_v27  ;;  %v638_v43 = vmax.f32 %v541_v29, 0.0  ;;  %v642_v50 = vmax.f32 %v614_v40, 0.0  ;;  %v617_v52 = vadd.f32 %v616_v47, %v1868_v37 }
  0xfd   : > { %v700_v48 = vmax.f32 %v1901_v5, %v682_v32  ;;  %v685_v49 = vmul.f32 %v661_v28, %v637_v33  ;;  %v696_v55 = vmul.f32 %v672_v39, %v648_v44  ;;  %v651_v56 = vmax.f32 %v625_v46, 0.0  ;;  %v670_v33 = vld [vmem:[%s2066_s3 + $0x90] sm:$0xff] }
  0xfe   : > { %v713_v53 = vmax.f32 %v1907_v11, %v683_v42  ;;  %v686_v54 = vmul.f32 %v662_v36, %v638_v43  ;;  %v544_v58 = vpop.f32.mrb[8].mxu0  ;;  %v690_v60 = vmul.f32 %v666_v45, %v642_v50  ;;  %v645_v61 = vmax.f32 %v617_v52, 0.0  ;;  %v667_v11 = vld [vmem:[%s2066_s3 + $0x78] sm:$0xff]  ;;  %v673_v45 = vld [vmem:[%s2066_s3 + $0xa8] sm:$0xff]  ;;  %v674_v50 = vld [vmem:[%s2066_s3 + $0xb0] sm:$0xff] }
  0xff   : > { %v701_v59 = vmax.f32 %v1909_v12, %v685_v49  ;;  %v545_v62 = vadd.f32 %v544_v58, %v1864_v34  ;;  %v546_v63 = vpop.f32.mrb[9].mxu0  ;;  %v699_v37 = vmul.f32 %v675_v51, %v651_v56 }
 0x100   : > { %v714_v0 = vmax.f32 %v1920_v26, %v686_v54  ;;  %v547_v2 = vadd.f32 %v546_v63, %v1866_v35  ;;  %v548_v3 = vpop.f32.mrb[10].mxu0  ;;  %v728_v4 = vmax.f32 %v726_v21, %v690_v60  ;;  %v693_v5 = vmul.f32 %v669_v57, %v645_v61 }
 0x101   : > { %v640_v6 = vmax.f32 %v545_v62, 0.0  ;;  %v549_v8 = vadd.f32 %v548_v3, %v1864_v34  ;;  %v550_v9 = vpop.f32.mrb[11].mxu0 }
 0x102   : > { %v641_v10 = vmax.f32 %v547_v2, 0.0  ;;  %v551_v12 = vadd.f32 %v550_v9, %v1866_v35  ;;  %v730_v13 = vmax.f32 %v728_v4, %v696_v55  ;;  %v729_v15 = vmax.f32 %v727_v38, %v693_v5 }
 0x103   : > { %v688_v16 = vmul.f32 %v664_v1, %v640_v6  ;;  %v643_v17 = vmax.f32 %v549_v8, 0.0 }
 0x104   : > { %v689_v20 = vmul.f32 %v665_v7, %v641_v10  ;;  %v644_v21 = vmax.f32 %v551_v12, 0.0  ;;  %v731_v22 = vmax.f32 %v729_v15, %v699_v37  ;;  %v859_v10 = vpop.f32.mrb[8].mxu1  ;;  %v1011_v12 = vld [vmem:[%s2071_s8] sm:$0xff] }
 0x105   : > { %v702_v23 = vmax.f32 %v700_v48, %v688_v16  ;;  %v691_v24 = vmul.f32 %v667_v11, %v643_v17  ;;  %v1295_v11 = vpop.f32.mrb[9].mxu1  ;;  %v1013_v16 = vld [vmem:[%s2071_s8 + $0x10] sm:$0xff] }
 0x106   : > { %v715_v25 = vmax.f32 %v713_v53, %v689_v20  ;;  %v692_v26 = vmul.f32 %v668_v19, %v644_v21  ;;  %v554_v27 = vpop.f32.mrb[12].mxu0  ;;  %v732_v28 = vmax.f32 %v730_v13, %v731_v22  ;;  %v1012_v13 = vld [vmem:[%s2071_s8 + $0x8] sm:$0xff]  ;;  %v1015_v19 = vld [vmem:[%s2071_s8 + $0x20] sm:$0xff]  ;;  %v1017_v22 = vld [vmem:[%s2071_s8 + $0x30] sm:$0xff] }
 0x107   : > { %v703_v29 = vmax.f32 %v701_v59, %v691_v24  ;;  %v555_v30 = vadd.f32 %v554_v27, %v1864_v34  ;;  %v556_v31 = vpop.f32.mrb[13].mxu0  ;;  %v1407_v15 = vpack.c.bf16 %v1012_v13, %v1011_v12  ;;  %v1016_v20 = vld [vmem:[%s2071_s8 + $0x28] sm:$0xff] }
 0x108   : > { %v716_v32 = vmax.f32 %v714_v0, %v692_v26  ;;  %v557_v36 = vadd.f32 %v556_v31, %v1866_v35  ;;  %v558_v38 = vpop.f32.mrb[14].mxu0  ;;  %v733_v39 = vrot.slane %v732_v28, 4  ;;  %v1413_v21 = vpack.c.bf16 %v1016_v20, %v1015_v19  ;;  %v1003_v31 = vld [vmem:[%s2070_s7] sm:$0x1] }
 0x109   : > { %v646_v40 = vmax.f32 %v555_v30, 0.0  ;;  %v559_v42 = vadd.f32 %v558_v38, %v1864_v34  ;;  %v560_v43 = vpop.f32.mrb[15].mxu0 }
 0x10a   : > { %v647_v44 = vmax.f32 %v557_v36, 0.0  ;;  %v561_v46 = vadd.f32 %v560_v43, %v1866_v35  ;;  %v734_v47 = vmax.f32 %v732_v28, %v733_v39 }
 0x10b   : > { %v694_v48 = vmul.f32 %v670_v33, %v646_v40  ;;  %v649_v49 = vmax.f32 %v559_v42, 0.0  ;;  %v1019_v40 = vld [vmem:[%s2072_s9] sm:$0x1] }
 0x10c   : > { %v695_v51 = vmul.f32 %v671_v41, %v647_v44  ;;  %v650_v52 = vmax.f32 %v561_v46, 0.0  ;;  %v735_v34 = vrot.slane %v734_v47, 2 }
 0x10d   : > { %v704_v53 = vmax.f32 %v702_v23, %v694_v48  ;;  %v697_v54 = vmul.f32 %v673_v45, %v649_v49  ;;  %v1018_v23 = vld [vmem:[%s2071_s8 + $0x38] sm:$0xff] }
 0x10e   : > { %v717_v55 = vmax.f32 %v715_v25, %v695_v51  ;;  %v698_v56 = vmul.f32 %v674_v50, %v650_v52  ;;  %v736_v58 = vmax.f32 %v734_v47, %v735_v34  ;;  %v1416_v24 = vpack.c.bf16 %v1018_v23, %v1017_v22 }
 0x10f   : > { %v705_v57 = vmax.f32 %v703_v29, %v697_v54 }
 0x110   : > { %v718_v59 = vmax.f32 %v716_v32, %v698_v56  ;;  %v737_v61 = vrot.slane %v736_v58, 1 }
 0x111   : > { %v706_v60 = vmax.f32 %v704_v53, %v705_v57 }
 0x112   : > { %v719_v35 = vmax.f32 %v717_v55, %v718_v59  ;;  %v738_v63 = vmax.f32 %v736_v58, %v737_v61 }
 0x113   : > { %v707_v62 = vrot.slane %v706_v60, 4 }
 0x114   : > { %v720_v0 = vrot.slane %v719_v35, 4  ;;  %1329 = vmatmul.mubr.f32.vlgmr.msra.gmra.mrb[10].mxu1 %v738_v63 }
 0x115   : > { %v708_v37 = vmax.f32 %v706_v60, %v707_v62 }
 0x116   : > { %v721_v1 = vmax.f32 %v719_v35, %v720_v0 }
 0x117   : > { %v709_v2 = vrot.slane %v708_v37, 2 }
 0x118   : > { %v722_v3 = vrot.slane %v721_v1, 2 }
 0x119   : > { %v710_v4 = vmax.f32 %v708_v37, %v709_v2 }
 0x11a   : > { %v723_v5 = vmax.f32 %v721_v1, %v722_v3 }
 0x11b   : > { %v711_v6 = vrot.slane %v710_v4, 1 }
 0x11c   : > { %v724_v7 = vrot.slane %v723_v5, 1 }
 0x11d   : > { %v712_v9 = vmax.f32 %v710_v4, %v711_v6 }
 0x11e   : > { %v725_v8 = vmax.f32 %v723_v5, %v724_v7 }
 0x120   : > { %927 = vmatprep.mubr.f32.mxu0 %v725_v8 }
 0x121   : > { %928 = vmatmul.mubr.f32.vlgmr.msra.gmra.mrb[16].mxu0 %v712_v9 }
 0x122   : > { %1347 = vmatprep.mubr.msk.f32.mxu0 %vm1547_vm1, %v1546_v14  ;;  %1408 = vmatpush3.bf16.msra.mxu0 %v1407_v15  ;;  %v1014_v14 = vld [vmem:[%s2071_s8 + $0x18] sm:$0xff] }
 0x123   : > { %1409 = vmatprep.subr.bf16.mxu0 %v1548_v18  ;;  %v1410_v17 = vpack.c.bf16 %v1014_v14, %v1013_v16 }
 0x126   : > { %1411 = vmatpush3.bf16.msra.mxu0 %v1410_v17 }
 0x127   : > { %1412 = vmatprep.subr.bf16.mxu0 %v1548_v18 }
 0x12a   : > { %1414 = vmatpush3.bf16.msra.mxu0 %v1413_v21 }
 0x12b   : > { %1415 = vmatprep.subr.bf16.mxu0 %v1548_v18 }
 0x12e   : > { %1417 = vmatpush3.bf16.msra.mxu0 %v1416_v24 }
 0x1e7   : > { %v999_v25 = vpop.f32.mrb[10].mxu1 }
 0x1e8   : > { %v1330_v26 = vpop.f32.mrb[11].mxu1 }
 0x1f4   : > { %v1248_v27 = vpop.f32.mrb[16].mxu0 }
 0x1f5   : > { %v1249_v28 = vpop.f32.mrb[17].mxu0 }
 0x1f6   : > { %v1250_v29 = vadd.f32 %v1249_v28, %v1248_v27 }
 0x1f8   : > { %v930_v30 = vadd.f32 %v1250_v29, %v859_v10 }
 0x1fa   : > { %v1000_v32 = vadd.f32 %v999_v25, %v930_v30 }
 0x1fc   : > { %v1004_v33 = vadd.f32 %v1003_v31, %v1000_v32 }
 0x1fe   : > { %v1201_v36 = vmul.f32 -1.442695, %v1004_v33 }
 0x200   : > { %1477 = vpow2.f32 %v1201_v36 }
 0x20a   : > { %v1478_v38 = vpop.eup %1477 }
 0x20b   : > { %v1008_v39 = vadd.f32 1.0, %v1478_v38 }
 0x20d   : > { %1479 = vrcp.f32 %v1008_v39 }
 0x217   : > { %v1480_v18 = vpop.eup %1479 }
 0x218   : > { %1348 = vmatmul.mubr.msk.f32.vlgmr.msra.gmra.mrb[18].mxu0 %vm1020_vm3, %v1480_v18 }
 0x2eb   : > { %v1090_v41 = vpop.f32.mrb[18].mxu0 }
 0x2ec   : > { %v1091_v42 = vadd.f32 %v1090_v41, %v1019_v40  ;;  %v1349_v43 = vpop.f32.mrb[19].mxu0 }
 0x2ee   : > { %1095 = vst.msk [vmem:[%s362_s30] sm:$0x1] %vm1094_vm4, %v1091_v42 }
 0x2ef   : > { %1494 = shalt.err (!%p1491_p3)
}
 0x2f0   : > { %s1495_s26 = scalar_lea.hbm %s2021_s20, 16  ;;  %s1499_s30 = scalar_lea.hbm %s2073_s10, 32 }
 0x2f1   : > { %p1496_p4 = scmp.ne.s32.totalorder %s2021_s20, %s1495_s26  ;;  %p1500_p9 = scmp.lt.u32.totalorder %s2021_s20, %s2073_s10 }
 0x2f2   : > { %p1501_p10 = scmp.lt.u32.totalorder %s1499_s30, %s1495_s26  ;;  %p1503_p12 = scmp.lt.u32.totalorder %s1495_s26, %s2021_s20 }
 0x2f3   : > { %p1497_p7 = pnand %p1496_p4, %p1643_p5 }
 0x2f4   : > { %p1502_p11 = por %p1501_p10, %p1500_p9 }
 0x2f5   : > { %p1498_p8 = pneg %p1497_p7 }
 0x2f6   : > { %p1504_p13 = por %p1503_p12, %p1502_p11 }
 0x2f8   : > { %p1505_p0 = pnand %p1504_p13, %p1498_p8 }
 0x2fa   : > { %1508 = shalt.err (!%p1505_p0)
}
 0x2fb   : > { %1418 = dma.vmem_to_hbm [thread:$0]  (%p1643_p5), %s2023_s11, 16, %s2021_s20, %s1097_s25  }
 0x2fc PF: > { %p1424_p1 = scmp.ge.s32.totalorder %s1543_s16, 2  ;;  %s1121_s21 = sand.u32 1, %s1531_s13  }
 0x2fd   : > { %s1122_s17 = scalar_lea.sflag [#allocation3], %s1121_s21 }
 0x2fe   : > { %p1421_p2 = pnand %p1424_p1, %p1647_p6 }
 0x300   : > { %1526 = dma.done.wait (!%p1421_p2), %s1122_s17, 16  }
 0x301   : > { %1528 = vsyncadd (!%p1421_p2), %s1122_s17, 4294967280  ;;  %s2077_s22 = sld [smem:[#allocation5_spill]]  ;;  %p20_p3 = scmp.ge.s32.totalorder %s1630_s19, 4  }
 0x302   : > { %s2078_s13 = smov %s1535_s14  ;;  %s2079_s14 = smov %s1539_s15 }
 0x303   : > { %s2081_s16 = smov %s1630_s19  ;;  %22 = sbr.rel (!%p20_p3) target bundleno = 3 (0x3), region = 98 }
 0x307   : > { %s2080_s15 = smov %s2077_s22 }
 0x30a   :  { %1126 = vsyncpa [#allocation3], 1 }
 0x30b   :  { %1128 = vsyncpa [#allocation3 + $0x1], 1 }

</bundles_post_ra>
